<compile_context>
chip_gen: v7x
topology: tpu7x:2x2x1
jax: 0.10.0
libtpu: 0.0.40
codegen_flags: <defaults>
</compile_context>

<pallas_src>
import functools
import math

import jax
import jax.numpy as jnp
from jax.experimental import pallas as pl
from jax.experimental.pallas import tpu as pltpu


# ---------------------------------------------------------------------------
# Fused kernel: whole gated_resnet forward for a block of samples.
# ---------------------------------------------------------------------------

def _gated_resnet_kernel(og_ref, w1_ref, bn1s_ref, bn1b_ref, rw2_ref, rb2_ref,
                         e2_ref, bn2s_ref, bn2b_ref, out_ref, hext_ref, p2_ref,
                         *, n_filters, n_hidden, n_experts, ksize, height, width,
                         pad, dil, margin):
    """Per-grid-step refs:
       og_ref  : (SB, F,  HWE)      flat og_x with zero margins of MARG lanes
       w1_ref  : (SB, KK, C2, F)    per-sample mixed conv1 weights, tap-major
       bn1s/b  : (C2, 1)            BN1 inference scale / shift
       rw2/rb2 : (E, C2) / (E, 1)   conv2 routing Linear
       e2_ref  : (E, C2, KK*C2)     conv2 expert table, tap-major columns
       bn2s/b  : (F, 1)             BN2 inference scale / shift
       out_ref : (SB, F, HW)
       hext_ref: (C2, HWE)  scratch zero-margined hidden activation
       p2_ref  : (KK*C2, HW) scratch im2col patches of h
    """
    f32 = jnp.float32
    F, C2, E, K = n_filters, n_hidden, n_experts, ksize
    H, W, HW = height, width, height * width
    MARG = margin
    PT = K * K * C2
    SB = out_ref.shape[0]

    # Column-validity masks per horizontal tap offset dw.  Vertical out-of-range
    # taps read the zero margins of the flat-extended buffers and need no mask.
    jcol = jax.lax.broadcasted_iota(jnp.int32, (1, HW), 1) % W
    masks = {}
    for kw in range(K):
        dw = kw * dil - pad
        if dw != 0 and dw not in masks:
            masks[dw] = ((jcol + dw >= 0) & (jcol + dw < W)).astype(og_ref.dtype)

    # Zero the hidden-activation margins once; the centre is rewritten per sample.
    hext_ref[...] = jnp.zeros_like(hext_ref)

    for s in range(SB):
        # ---------------- CondConv #1 + BN1 + ReLU (tap-accumulated) -----------
        acc1 = jnp.zeros((C2, HW), f32)
        og_center = None
        for kh in range(K):
            dh = kh * dil - pad
            for kw in range(K):
                dw = kw * dil - pad
                off = dh * W + dw
                raw = og_ref[s, :, MARG + off:MARG + off + HW]          # (F, HW)
                if dh == 0 and dw == 0:
                    og_center = raw                                     # residual
                tap = raw if dw == 0 else raw * masks[dw]
                wt = w1_ref[s, kh * K + kw]                             # (C2, F)
                acc1 += jnp.dot(wt, tap, preferred_element_type=f32)
        h = jnp.maximum(acc1 * bn1s_ref[...] + bn1b_ref[...], 0.0)      # (C2, HW) f32
        # Dropout2d: identity at inference.

        # ---------------- CondConv #2 routing + expert mixing (in-kernel) ------
        # mean_HW(rw2 @ h) == rw2 @ mean_HW(h); avoids an N=1 matmul.
        t2 = jnp.dot(rw2_ref[...], h, preferred_element_type=f32)       # (E, HW)
        logits2 = jnp.mean(t2, axis=-1, keepdims=True) + rb2_ref[...]   # (E, 1)
        r2 = jnp.broadcast_to(jax.nn.sigmoid(logits2), (E, PT))         # (E, PT)
        w2 = r2[0:1, :] * e2_ref[0]                                     # (C2, PT)
        for e in range(1, E):
            w2 = w2 + r2[e:e + 1, :] * e2_ref[e]

        # ---------------- in-VMEM im2col of h + single conv2 matmul ------------
        hext_ref[:, MARG:MARG + HW] = h.astype(hext_ref.dtype)
        for kh in range(K):
            dh = kh * dil - pad
            for kw in range(K):
                dw = kw * dil - pad
                off = dh * W + dw
                raw = hext_ref[:, MARG + off:MARG + off + HW]           # (C2, HW)
                tap = raw if dw == 0 else raw * masks[dw]
                t = kh * K + kw
                p2_ref[t * C2:(t + 1) * C2, :] = tap
        acc2 = jnp.dot(w2.astype(p2_ref.dtype), p2_ref[...],
                       preferred_element_type=f32)                      # (C2, HW)

        # ---------------- gate + residual + BN2 --------------------------------
        a = acc2[0:F, :]
        g = acc2[F:C2, :]
        c3 = a * jax.nn.sigmoid(g)
        res = og_center.astype(f32) + c3
        out_ref[s] = (res * bn2s_ref[...] + bn2b_ref[...]).astype(out_ref.dtype)


# ---------------------------------------------------------------------------
# Wrapper: layout plumbing (XLA) + single pallas_call.
# ---------------------------------------------------------------------------

def gated_resnet_forward(og_x, params, *, kernel_size, padding, dilation,
                         eps=1e-5, samples_per_block=1):
    """Inference forward of gated_resnet.  og_x: (B, F, H, W) NCHW."""
    B, F, H, W = og_x.shape
    C2 = 2 * F
    K, pad, dil = kernel_size, padding, dilation
    assert 2 * pad == (K - 1) * dil, "residual add needs a 'same' convolution"
    SB = samples_per_block            # >1 amortizes per-step overhead on v5e/v6e
    assert B % SB == 0
    KK, HW = K * K, H * W
    E = params["rw1"].shape[0]
    dt = og_x.dtype
    # Flat zero margin so every conv tap is a plain lane-offset window read.
    MARG = -(-(pad * (W + 1)) // 128) * 128
    HWE = HW + 2 * MARG
    # NOTE: H*W (=256 here) is a multiple of 128 -> unmasked lane-dense output
    # stores; the spatial means always divide by the true H*W (no HW padding).

    og_flat = og_x.reshape(B, F, HW)
    og_ext = jnp.pad(og_flat, ((0, 0), (0, 0), (MARG, MARG)))

    hi = jax.lax.Precision.HIGHEST
    # CondConv#1 routing + expert mixing: a few thousand FLOPs -> plain XLA (a
    # dedicated pallas_call is pure dispatch overhead).  In a real deployment the
    # rearranged tables below would be precomputed once outside the forward.
    pooled1 = jnp.mean(og_flat.astype(jnp.float32), axis=-1)               # (B, F)
    r1 = jax.nn.sigmoid(
        jnp.dot(pooled1, params["rw1"].T.astype(jnp.float32), precision=hi)
        + params["rb1"].astype(jnp.float32))                               # (B, E)
    wmix1 = jnp.dot(r1, params["experts1"].astype(jnp.float32), precision=hi)
    # tap-major per-sample conv1 weights: w1[b, t, o, i] = wmix1[b, o, i, kh, kw]
    w1 = (wmix1.reshape(B, C2, F, K, K)
          .transpose(0, 3, 4, 1, 2)
          .reshape(B, KK, C2, F)
          .astype(dt))

    # conv2 expert table, tap-major columns: e2[e, o, t*C2+i] = experts2[e, o, i, kh, kw]
    e2 = (params["experts2"].reshape(E, C2, C2, K, K)
          .transpose(0, 1, 3, 4, 2)
          .reshape(E, C2, KK * C2)
          .astype(jnp.float32))

    bn1_scale = params["bn1_gamma"] * jax.lax.rsqrt(params["bn1_var"] + eps)
    bn1_shift = params["bn1_beta"] - params["bn1_mean"] * bn1_scale
    bn2_scale = params["bn2_gamma"] * jax.lax.rsqrt(params["bn2_var"] + eps)
    bn2_shift = params["bn2_beta"] - params["bn2_mean"] * bn2_scale

    # Scoped-VMEM budget: double-buffered in/out blocks at real dtypes + scratch
    # + headroom, clamped well under v7x's 64 MiB per-TensorCore VMEM.
    esz = jnp.dtype(dt).itemsize
    io_bytes = (SB * F * HWE * esz + SB * KK * C2 * F * esz                 # og, w1
                + (2 * C2 + E * C2 + E + E * C2 * KK * C2 + 2 * F) * 4      # params
                + SB * F * HW * esz)                                        # out
    scratch_bytes = (C2 * HWE + KK * C2 * HW) * esz
    vmem_bytes = int(min(max(2 * io_bytes + scratch_bytes + (4 << 20), 8 << 20),
                         48 << 20))

    kernel = functools.partial(
        _gated_resnet_kernel,
        n_filters=F, n_hidden=C2, n_experts=E, ksize=K,
        height=H, width=W, pad=pad, dil=dil, margin=MARG)

    out_flat = pl.pallas_call(
        kernel,
        out_shape=jax.ShapeDtypeStruct((B, F, HW), dt),
        grid_spec=pltpu.PrefetchScalarGridSpec(
            num_scalar_prefetch=0,
            grid=(B // SB,),
            in_specs=[
                pl.BlockSpec((SB, F, HWE), lambda i: (i, 0, 0)),        # og_ext
                pl.BlockSpec((SB, KK, C2, F), lambda i: (i, 0, 0, 0)),  # mixed w1
                pl.BlockSpec((C2, 1), lambda i: (0, 0)),                # BN1 scale
                pl.BlockSpec((C2, 1), lambda i: (0, 0)),                # BN1 shift
                pl.BlockSpec((E, C2), lambda i: (0, 0)),                # routing2 W
                pl.BlockSpec((E, 1), lambda i: (0, 0)),                 # routing2 b
                pl.BlockSpec((E, C2, KK * C2), lambda i: (0, 0, 0)),    # experts2
                pl.BlockSpec((F, 1), lambda i: (0, 0)),                 # BN2 scale
                pl.BlockSpec((F, 1), lambda i: (0, 0)),                 # BN2 shift
            ],
            out_specs=pl.BlockSpec((SB, F, HW), lambda i: (i, 0, 0)),
            scratch_shapes=[
                pltpu.VMEM((C2, HWE), dt),        # zero-margined hidden activation
                pltpu.VMEM((KK * C2, HW), dt),    # im2col patches of h
            ],
        ),
        compiler_params=pltpu.CompilerParams(
            dimension_semantics=("parallel",),
            vmem_limit_bytes=vmem_bytes),
    )(og_ext, w1,
      bn1_scale.reshape(C2, 1).astype(jnp.float32),
      bn1_shift.reshape(C2, 1).astype(jnp.float32),
      params["rw2"].astype(jnp.float32),
      params["rb2"].reshape(E, 1).astype(jnp.float32),
      e2,
      bn2_scale.reshape(F, 1).astype(jnp.float32),
      bn2_shift.reshape(F, 1).astype(jnp.float32))

    return out_flat.reshape(B, F, H, W)


# ---------------------------------------------------------------------------
# Pure-JAX reference (inference-mode forward of the PyTorch module)
# ---------------------------------------------------------------------------

def _condconv_ref(x, rw, rb, experts, cout, k, pad, dil):
    b, cin, _, _ = x.shape
    pooled = jnp.mean(x, axis=(2, 3))
    r = jax.nn.sigmoid(
        jnp.dot(pooled, rw.T, precision=jax.lax.Precision.HIGHEST) + rb)
    wmix = jnp.dot(r, experts, precision=jax.lax.Precision.HIGHEST)
    wmix = wmix.reshape(b, cout, cin, k, k)

    def one(xb, wb):
        return jax.lax.conv_general_dilated(
            xb[None], wb, window_strides=(1, 1),
            padding=[(pad, pad), (pad, pad)], rhs_dilation=(dil, dil),
            dimension_numbers=("NCHW", "OIHW", "NCHW"),
            precision=jax.lax.Precision.HIGHEST)[0]

    return jax.vmap(one)(x, wmix)


def _bn_inf(x, gamma, beta, mean, var, eps):
    scale = gamma / jnp.sqrt(var + eps)
    shift = beta - mean * scale
    return x * scale[None, :, None, None] + shift[None, :, None, None]


def _reference(og_x, params, *, kernel_size, padding, dilation, eps=1e-5):
    f = og_x.shape[1]
    k, pad, dil = kernel_size, padding, dilation
    x = _condconv_ref(og_x, params["rw1"], params["rb1"], params["experts1"],
                      2 * f, k, pad, dil)
    x = _bn_inf(x, params["bn1_gamma"], params["bn1_beta"],
                params["bn1_mean"], params["bn1_var"], eps)
    x = jnp.maximum(x, 0.0)              # ReLU; Dropout2d is identity in inference
    x = _condconv_ref(x, params["rw2"], params["rb2"], params["experts2"],
                      2 * f, k, pad, dil)
    a, bgate = x[:, :f], x[:, f:]
    out = og_x + a * jax.nn.sigmoid(bgate)
    return _bn_inf(out, params["bn2_gamma"], params["bn2_beta"],
                   params["bn2_mean"], params["bn2_var"], eps)


if __name__ == "__main__":
    B, F, H, W = 2, 4, 16, 16      # batch=2, num_filters=4, 16x16 feature map
    K, PAD, DIL, E = 3, 1, 1, 4    # kernel_size=3, padding=1, dilation=1, 4 experts
    EPS = 1e-5
    C2 = 2 * F

    key = jax.random.PRNGKey(0)
    ks = jax.random.split(key, 15)

    og_x = jax.random.normal(ks[0], (B, F, H, W), dtype=jnp.float32)

    b_r1 = 1.0 / math.sqrt(F)
    b_r2 = 1.0 / math.sqrt(C2)
    b_w1 = 1.0 / math.sqrt(F * K * K)
    b_w2 = 1.0 / math.sqrt(C2 * K * K)
    params = {
        # CondConv #1 (F -> 2F): routing Linear(F, E) + experts (E, 2F*F*K*K)
        "rw1": jax.random.uniform(ks[1], (E, F), jnp.float32, -b_r1, b_r1),
        "rb1": jax.random.uniform(ks[2], (E,), jnp.float32, -b_r1, b_r1),
        "experts1": jax.random.uniform(ks[3], (E, C2 * F * K * K), jnp.float32,
                                       -b_w1, b_w1),
        # CondConv #2 (2F -> 2F)
        "rw2": jax.random.uniform(ks[4], (E, C2), jnp.float32, -b_r2, b_r2),
        "rb2": jax.random.uniform(ks[5], (E,), jnp.float32, -b_r2, b_r2),
        "experts2": jax.random.uniform(ks[6], (E, C2 * C2 * K * K), jnp.float32,
                                       -b_w2, b_w2),
        # BatchNorm running stats + affine (inference mode)
        "bn1_gamma": jax.random.uniform(ks[7], (C2,), jnp.float32, 0.5, 1.5),
        "bn1_beta": 0.1 * jax.random.normal(ks[8], (C2,), jnp.float32),
        "bn1_mean": 0.1 * jax.random.normal(ks[9], (C2,), jnp.float32),
        "bn1_var": jax.random.uniform(ks[10], (C2,), jnp.float32, 0.5, 1.5),
        "bn2_gamma": jax.random.uniform(ks[11], (F,), jnp.float32, 0.5, 1.5),
        "bn2_beta": 0.1 * jax.random.normal(ks[12], (F,), jnp.float32),
        "bn2_mean": 0.1 * jax.random.normal(ks[13], (F,), jnp.float32),
        "bn2_var": jax.random.uniform(ks[14], (F,), jnp.float32, 0.5, 1.5),
    }

    forward = jax.jit(functools.partial(
        gated_resnet_forward, kernel_size=K, padding=PAD, dilation=DIL, eps=EPS))

    out = forward(og_x, params)
    jax.block_until_ready(out)

    ref = _reference(og_x, params, kernel_size=K, padding=PAD, dilation=DIL, eps=EPS)
    assert out.shape == og_x.shape
    err = float(jnp.max(jnp.abs(out - ref)))
    assert jnp.allclose(out, ref, atol=1e-3, rtol=1e-3), f"max abs err = {err}"

    print("KERNEL_OK")
</pallas_src>

<mosaic_0001>
module attributes {stable_mosaic.version = 11 : i64} {
  func.func @_gated_resnet_kernel(%arg0: i32, %arg1: memref<1x4x512xf32, #tpu.memory_space<vmem>>, %arg2: memref<1x9x8x4xf32, #tpu.memory_space<vmem>>, %arg3: memref<8x1xf32, #tpu.memory_space<vmem>>, %arg4: memref<8x1xf32, #tpu.memory_space<vmem>>, %arg5: memref<4x8xf32, #tpu.memory_space<vmem>>, %arg6: memref<4x1xf32, #tpu.memory_space<vmem>>, %arg7: memref<4x8x72xf32, #tpu.memory_space<vmem>>, %arg8: memref<4x1xf32, #tpu.memory_space<vmem>>, %arg9: memref<4x1xf32, #tpu.memory_space<vmem>>, %arg10: memref<1x4x256xf32, #tpu.memory_space<vmem>>, %arg11: memref<8x512xf32, #tpu.memory_space<vmem>>, %arg12: memref<72x256xf32, #tpu.memory_space<vmem>>) attributes {dimension_semantics = [#tpu.dimension_semantics<parallel>], iteration_bounds = array<i64: 2>, scalar_prefetch = 0 : i64, scratch_operands = 2 : i64, tpu.core_type = #tpu.core_type<tc>, window_params = [{transform_indices = @transform_0, window_bounds = array<i64: 1, 4, 512>}, {transform_indices = @transform_1, window_bounds = array<i64: 1, 9, 8, 4>}, {pipeline_mode = #tpu.pipeline_mode<synchronous>, transform_indices = @transform_2, window_bounds = array<i64: 8, 1>}, {pipeline_mode = #tpu.pipeline_mode<synchronous>, transform_indices = @transform_3, window_bounds = array<i64: 8, 1>}, {pipeline_mode = #tpu.pipeline_mode<synchronous>, transform_indices = @transform_4, window_bounds = array<i64: 4, 8>}, {pipeline_mode = #tpu.pipeline_mode<synchronous>, transform_indices = @transform_5, window_bounds = array<i64: 4, 1>}, {pipeline_mode = #tpu.pipeline_mode<synchronous>, transform_indices = @transform_6, window_bounds = array<i64: 4, 8, 72>}, {pipeline_mode = #tpu.pipeline_mode<synchronous>, transform_indices = @transform_7, window_bounds = array<i64: 4, 1>}, {pipeline_mode = #tpu.pipeline_mode<synchronous>, transform_indices = @transform_8, window_bounds = array<i64: 4, 1>}, {transform_indices = @transform_9, window_bounds = array<i64: 1, 4, 256>}]} {
    %0 = tpu.iota {dimensions = array<i32: 1>} : vector<1x256xi32>
    %c16_i32 = arith.constant 16 : i32
    %c0_i32 = arith.constant 0 : i32
    %1 = arith.cmpi eq, %c16_i32, %c0_i32 : i32
    %c1_i32 = arith.constant 1 : i32
    %2 = arith.select %1, %c1_i32, %c16_i32 : i32
    %3 = vector.broadcast %2 : i32 to vector<1x256xi32>
    %4 = arith.remsi %0, %3 : vector<1x256xi32>
    %c0_i32_0 = arith.constant 0 : i32
    %5 = vector.broadcast %c0_i32_0 : i32 to vector<1x256xi32>
    %6 = arith.cmpi ne, %4, %5 : vector<1x256xi32>
    %c0_i32_1 = arith.constant 0 : i32
    %7 = vector.broadcast %c0_i32_1 : i32 to vector<1x256xi32>
    %8 = arith.cmpi slt, %4, %7 : vector<1x256xi32>
    %c0_i32_2 = arith.constant 0 : i32
    %9 = arith.cmpi slt, %2, %c0_i32_2 : i32
    %10 = vector.broadcast %9 : i1 to vector<1x256xi1>
    %11 = vector.broadcast %10 : vector<1x256xi1> to vector<1x256xi1>
    %12 = arith.xori %8, %11 : vector<1x256xi1>
    %13 = arith.andi %12, %6 : vector<1x256xi1>
    %14 = vector.broadcast %2 : i32 to vector<1x256xi32>
    %15 = arith.addi %4, %14 : vector<1x256xi32>
    %16 = arith.select %13, %15, %4 : vector<1x256xi1>, vector<1x256xi32>
    %c-1_i32 = arith.constant -1 : i32
    %17 = vector.broadcast %c-1_i32 : i32 to vector<1x256xi32>
    %18 = arith.addi %16, %17 : vector<1x256xi32>
    %c0_i32_3 = arith.constant 0 : i32
    %19 = vector.broadcast %c0_i32_3 : i32 to vector<1x256xi32>
    %20 = arith.cmpi sge, %18, %19 : vector<1x256xi32>
    %c-1_i32_4 = arith.constant -1 : i32
    %21 = vector.broadcast %c-1_i32_4 : i32 to vector<1x256xi32>
    %22 = arith.addi %16, %21 : vector<1x256xi32>
    %c16_i32_5 = arith.constant 16 : i32
    %23 = vector.broadcast %c16_i32_5 : i32 to vector<1x256xi32>
    %24 = arith.cmpi slt, %22, %23 : vector<1x256xi32>
    %25 = arith.andi %20, %24 : vector<1x256xi1>
    %26 = arith.extui %25 : vector<1x256xi1> to vector<1x256xi32>
    %27 = arith.sitofp %26 : vector<1x256xi32> to vector<1x256xf32>
    %c1_i32_6 = arith.constant 1 : i32
    %28 = vector.broadcast %c1_i32_6 : i32 to vector<1x256xi32>
    %29 = arith.addi %16, %28 : vector<1x256xi32>
    %c0_i32_7 = arith.constant 0 : i32
    %30 = vector.broadcast %c0_i32_7 : i32 to vector<1x256xi32>
    %31 = arith.cmpi sge, %29, %30 : vector<1x256xi32>
    %c1_i32_8 = arith.constant 1 : i32
    %32 = vector.broadcast %c1_i32_8 : i32 to vector<1x256xi32>
    %33 = arith.addi %16, %32 : vector<1x256xi32>
    %c16_i32_9 = arith.constant 16 : i32
    %34 = vector.broadcast %c16_i32_9 : i32 to vector<1x256xi32>
    %35 = arith.cmpi slt, %33, %34 : vector<1x256xi32>
    %36 = arith.andi %31, %35 : vector<1x256xi1>
    %37 = arith.extui %36 : vector<1x256xi1> to vector<1x256xi32>
    %38 = arith.sitofp %37 : vector<1x256xi32> to vector<1x256xf32>
    %cst = arith.constant 0.000000e+00 : f32
    %39 = vector.broadcast %cst : f32 to vector<8x512xf32>
    %c0 = arith.constant 0 : index
    %c0_10 = arith.constant 0 : index
    %40 = vector.load %arg11[%c0, %c0_10] : memref<8x512xf32, #tpu.memory_space<vmem>>, vector<8x512xf32>
    tpu.vector_store %arg11[%c0, %c0_10], %39 {strides = array<i32>} : memref<8x512xf32, #tpu.memory_space<vmem>>, vector<8x512xf32>,
    %cst_11 = arith.constant 0.000000e+00 : f32
    %41 = vector.broadcast %cst_11 : f32 to vector<8x256xf32>
    %c0_12 = arith.constant 0 : index
    %c0_13 = arith.constant 0 : index
    %c111 = arith.constant 111 : index
    %42 = vector.load %arg1[%c0_12, %c0_13, %c111] : memref<1x4x512xf32, #tpu.memory_space<vmem>>, vector<1x4x256xf32>
    %43 = vector.shape_cast %42 : vector<1x4x256xf32> to vector<4x256xf32>
    %44 = vector.broadcast %27 : vector<1x256xf32> to vector<4x256xf32>
    %45 = arith.mulf %43, %44 : vector<4x256xf32>
    %c0_14 = arith.constant 0 : index
    %c0_15 = arith.constant 0 : index
    %c0_16 = arith.constant 0 : index
    %c0_17 = arith.constant 0 : index
    %46 = vector.load %arg2[%c0_14, %c0_15, %c0_16, %c0_17] : memref<1x9x8x4xf32, #tpu.memory_space<vmem>>, vector<1x1x8x4xf32>
    %47 = vector.shape_cast %46 : vector<1x1x8x4xf32> to vector<8x4xf32>
    %cst_18 = arith.constant dense<0.000000e+00> : vector<8x256xf32>
    %48 = tpu.matmul %47, %45, %cst_18 {dimension_numbers = #tpu.dot_dimension_numbers<[1], [0], [0], [1], [0, 0, 1, 1], [], []>} : vector<8x4xf32>, vector<4x256xf32>, vector<8x256xf32> -> vector<8x256xf32>
    %49 = arith.addf %41, %48 : vector<8x256xf32>
    %c0_19 = arith.constant 0 : index
    %c0_20 = arith.constant 0 : index
    %c112 = arith.constant 112 : index
    %50 = vector.load %arg1[%c0_19, %c0_20, %c112] : memref<1x4x512xf32, #tpu.memory_space<vmem>>, vector<1x4x256xf32>
    %51 = vector.shape_cast %50 : vector<1x4x256xf32> to vector<4x256xf32>
    %c0_21 = arith.constant 0 : index
    %c1 = arith.constant 1 : index
    %c0_22 = arith.constant 0 : index
    %c0_23 = arith.constant 0 : index
    %52 = vector.load %arg2[%c0_21, %c1, %c0_22, %c0_23] : memref<1x9x8x4xf32, #tpu.memory_space<vmem>>, vector<1x1x8x4xf32>
    %53 = vector.shape_cast %52 : vector<1x1x8x4xf32> to vector<8x4xf32>
    %cst_24 = arith.constant dense<0.000000e+00> : vector<8x256xf32>
    %54 = tpu.matmul %53, %51, %cst_24 {dimension_numbers = #tpu.dot_dimension_numbers<[1], [0], [0], [1], [0, 0, 1, 1], [], []>} : vector<8x4xf32>, vector<4x256xf32>, vector<8x256xf32> -> vector<8x256xf32>
    %55 = arith.addf %49, %54 : vector<8x256xf32>
    %c0_25 = arith.constant 0 : index
    %c0_26 = arith.constant 0 : index
    %c113 = arith.constant 113 : index
    %56 = vector.load %arg1[%c0_25, %c0_26, %c113] : memref<1x4x512xf32, #tpu.memory_space<vmem>>, vector<1x4x256xf32>
    %57 = vector.shape_cast %56 : vector<1x4x256xf32> to vector<4x256xf32>
    %58 = vector.broadcast %38 : vector<1x256xf32> to vector<4x256xf32>
    %59 = arith.mulf %57, %58 : vector<4x256xf32>
    %c0_27 = arith.constant 0 : index
    %c2 = arith.constant 2 : index
    %c0_28 = arith.constant 0 : index
    %c0_29 = arith.constant 0 : index
    %60 = vector.load %arg2[%c0_27, %c2, %c0_28, %c0_29] : memref<1x9x8x4xf32, #tpu.memory_space<vmem>>, vector<1x1x8x4xf32>
    %61 = vector.shape_cast %60 : vector<1x1x8x4xf32> to vector<8x4xf32>
    %cst_30 = arith.constant dense<0.000000e+00> : vector<8x256xf32>
    %62 = tpu.matmul %61, %59, %cst_30 {dimension_numbers = #tpu.dot_dimension_numbers<[1], [0], [0], [1], [0, 0, 1, 1], [], []>} : vector<8x4xf32>, vector<4x256xf32>, vector<8x256xf32> -> vector<8x256xf32>
    %63 = arith.addf %55, %62 : vector<8x256xf32>
    %c0_31 = arith.constant 0 : index
    %c0_32 = arith.constant 0 : index
    %c127 = arith.constant 127 : index
    %64 = vector.load %arg1[%c0_31, %c0_32, %c127] : memref<1x4x512xf32, #tpu.memory_space<vmem>>, vector<1x4x256xf32>
    %65 = vector.shape_cast %64 : vector<1x4x256xf32> to vector<4x256xf32>
    %66 = vector.broadcast %27 : vector<1x256xf32> to vector<4x256xf32>
    %67 = arith.mulf %65, %66 : vector<4x256xf32>
    %c0_33 = arith.constant 0 : index
    %c3 = arith.constant 3 : index
    %c0_34 = arith.constant 0 : index
    %c0_35 = arith.constant 0 : index
    %68 = vector.load %arg2[%c0_33, %c3, %c0_34, %c0_35] : memref<1x9x8x4xf32, #tpu.memory_space<vmem>>, vector<1x1x8x4xf32>
    %69 = vector.shape_cast %68 : vector<1x1x8x4xf32> to vector<8x4xf32>
    %cst_36 = arith.constant dense<0.000000e+00> : vector<8x256xf32>
    %70 = tpu.matmul %69, %67, %cst_36 {dimension_numbers = #tpu.dot_dimension_numbers<[1], [0], [0], [1], [0, 0, 1, 1], [], []>} : vector<8x4xf32>, vector<4x256xf32>, vector<8x256xf32> -> vector<8x256xf32>
    %71 = arith.addf %63, %70 : vector<8x256xf32>
    %c0_37 = arith.constant 0 : index
    %c0_38 = arith.constant 0 : index
    %c128 = arith.constant 128 : index
    %72 = vector.load %arg1[%c0_37, %c0_38, %c128] : memref<1x4x512xf32, #tpu.memory_space<vmem>>, vector<1x4x256xf32>
    %73 = vector.shape_cast %72 : vector<1x4x256xf32> to vector<4x256xf32>
    %c0_39 = arith.constant 0 : index
    %c4 = arith.constant 4 : index
    %c0_40 = arith.constant 0 : index
    %c0_41 = arith.constant 0 : index
    %74 = vector.load %arg2[%c0_39, %c4, %c0_40, %c0_41] : memref<1x9x8x4xf32, #tpu.memory_space<vmem>>, vector<1x1x8x4xf32>
    %75 = vector.shape_cast %74 : vector<1x1x8x4xf32> to vector<8x4xf32>
    %cst_42 = arith.constant dense<0.000000e+00> : vector<8x256xf32>
    %76 = tpu.matmul %75, %73, %cst_42 {dimension_numbers = #tpu.dot_dimension_numbers<[1], [0], [0], [1], [0, 0, 1, 1], [], []>} : vector<8x4xf32>, vector<4x256xf32>, vector<8x256xf32> -> vector<8x256xf32>
    %77 = arith.addf %71, %76 : vector<8x256xf32>
    %c0_43 = arith.constant 0 : index
    %c0_44 = arith.constant 0 : index
    %c129 = arith.constant 129 : index
    %78 = vector.load %arg1[%c0_43, %c0_44, %c129] : memref<1x4x512xf32, #tpu.memory_space<vmem>>, vector<1x4x256xf32>
    %79 = vector.shape_cast %78 : vector<1x4x256xf32> to vector<4x256xf32>
    %80 = vector.broadcast %38 : vector<1x256xf32> to vector<4x256xf32>
    %81 = arith.mulf %79, %80 : vector<4x256xf32>
    %c0_45 = arith.constant 0 : index
    %c5 = arith.constant 5 : index
    %c0_46 = arith.constant 0 : index
    %c0_47 = arith.constant 0 : index
    %82 = vector.load %arg2[%c0_45, %c5, %c0_46, %c0_47] : memref<1x9x8x4xf32, #tpu.memory_space<vmem>>, vector<1x1x8x4xf32>
    %83 = vector.shape_cast %82 : vector<1x1x8x4xf32> to vector<8x4xf32>
    %cst_48 = arith.constant dense<0.000000e+00> : vector<8x256xf32>
    %84 = tpu.matmul %83, %81, %cst_48 {dimension_numbers = #tpu.dot_dimension_numbers<[1], [0], [0], [1], [0, 0, 1, 1], [], []>} : vector<8x4xf32>, vector<4x256xf32>, vector<8x256xf32> -> vector<8x256xf32>
    %85 = arith.addf %77, %84 : vector<8x256xf32>
    %c0_49 = arith.constant 0 : index
    %c0_50 = arith.constant 0 : index
    %c143 = arith.constant 143 : index
    %86 = vector.load %arg1[%c0_49, %c0_50, %c143] : memref<1x4x512xf32, #tpu.memory_space<vmem>>, vector<1x4x256xf32>
    %87 = vector.shape_cast %86 : vector<1x4x256xf32> to vector<4x256xf32>
    %88 = vector.broadcast %27 : vector<1x256xf32> to vector<4x256xf32>
    %89 = arith.mulf %87, %88 : vector<4x256xf32>
    %c0_51 = arith.constant 0 : index
    %c6 = arith.constant 6 : index
    %c0_52 = arith.constant 0 : index
    %c0_53 = arith.constant 0 : index
    %90 = vector.load %arg2[%c0_51, %c6, %c0_52, %c0_53] : memref<1x9x8x4xf32, #tpu.memory_space<vmem>>, vector<1x1x8x4xf32>
    %91 = vector.shape_cast %90 : vector<1x1x8x4xf32> to vector<8x4xf32>
    %cst_54 = arith.constant dense<0.000000e+00> : vector<8x256xf32>
    %92 = tpu.matmul %91, %89, %cst_54 {dimension_numbers = #tpu.dot_dimension_numbers<[1], [0], [0], [1], [0, 0, 1, 1], [], []>} : vector<8x4xf32>, vector<4x256xf32>, vector<8x256xf32> -> vector<8x256xf32>
    %93 = arith.addf %85, %92 : vector<8x256xf32>
    %c0_55 = arith.constant 0 : index
    %c0_56 = arith.constant 0 : index
    %c144 = arith.constant 144 : index
    %94 = vector.load %arg1[%c0_55, %c0_56, %c144] : memref<1x4x512xf32, #tpu.memory_space<vmem>>, vector<1x4x256xf32>
    %95 = vector.shape_cast %94 : vector<1x4x256xf32> to vector<4x256xf32>
    %c0_57 = arith.constant 0 : index
    %c7 = arith.constant 7 : index
    %c0_58 = arith.constant 0 : index
    %c0_59 = arith.constant 0 : index
    %96 = vector.load %arg2[%c0_57, %c7, %c0_58, %c0_59] : memref<1x9x8x4xf32, #tpu.memory_space<vmem>>, vector<1x1x8x4xf32>
    %97 = vector.shape_cast %96 : vector<1x1x8x4xf32> to vector<8x4xf32>
    %cst_60 = arith.constant dense<0.000000e+00> : vector<8x256xf32>
    %98 = tpu.matmul %97, %95, %cst_60 {dimension_numbers = #tpu.dot_dimension_numbers<[1], [0], [0], [1], [0, 0, 1, 1], [], []>} : vector<8x4xf32>, vector<4x256xf32>, vector<8x256xf32> -> vector<8x256xf32>
    %99 = arith.addf %93, %98 : vector<8x256xf32>
    %c0_61 = arith.constant 0 : index
    %c0_62 = arith.constant 0 : index
    %c145 = arith.constant 145 : index
    %100 = vector.load %arg1[%c0_61, %c0_62, %c145] : memref<1x4x512xf32, #tpu.memory_space<vmem>>, vector<1x4x256xf32>
    %101 = vector.shape_cast %100 : vector<1x4x256xf32> to vector<4x256xf32>
    %102 = vector.broadcast %38 : vector<1x256xf32> to vector<4x256xf32>
    %103 = arith.mulf %101, %102 : vector<4x256xf32>
    %c0_63 = arith.constant 0 : index
    %c8 = arith.constant 8 : index
    %c0_64 = arith.constant 0 : index
    %c0_65 = arith.constant 0 : index
    %104 = vector.load %arg2[%c0_63, %c8, %c0_64, %c0_65] : memref<1x9x8x4xf32, #tpu.memory_space<vmem>>, vector<1x1x8x4xf32>
    %105 = vector.shape_cast %104 : vector<1x1x8x4xf32> to vector<8x4xf32>
    %cst_66 = arith.constant dense<0.000000e+00> : vector<8x256xf32>
    %106 = tpu.matmul %105, %103, %cst_66 {dimension_numbers = #tpu.dot_dimension_numbers<[1], [0], [0], [1], [0, 0, 1, 1], [], []>} : vector<8x4xf32>, vector<4x256xf32>, vector<8x256xf32> -> vector<8x256xf32>
    %107 = arith.addf %99, %106 : vector<8x256xf32>
    %c0_67 = arith.constant 0 : index
    %c0_68 = arith.constant 0 : index
    %108 = vector.load %arg3[%c0_67, %c0_68] : memref<8x1xf32, #tpu.memory_space<vmem>>, vector<8x1xf32>
    %109 = vector.broadcast %108 : vector<8x1xf32> to vector<8x256xf32>
    %110 = arith.mulf %107, %109 : vector<8x256xf32>
    %c0_69 = arith.constant 0 : index
    %c0_70 = arith.constant 0 : index
    %111 = vector.load %arg4[%c0_69, %c0_70] : memref<8x1xf32, #tpu.memory_space<vmem>>, vector<8x1xf32>
    %112 = vector.broadcast %111 : vector<8x1xf32> to vector<8x256xf32>
    %113 = arith.addf %110, %112 : vector<8x256xf32>
    %cst_71 = arith.constant 0.000000e+00 : f32
    %114 = vector.broadcast %cst_71 : f32 to vector<8x256xf32>
    %115 = arith.maximumf %113, %114 : vector<8x256xf32>
    %c0_72 = arith.constant 0 : index
    %c0_73 = arith.constant 0 : index
    %116 = vector.load %arg5[%c0_72, %c0_73] : memref<4x8xf32, #tpu.memory_space<vmem>>, vector<4x8xf32>
    %cst_74 = arith.constant dense<0.000000e+00> : vector<4x256xf32>
    %117 = tpu.matmul %116, %115, %cst_74 {dimension_numbers = #tpu.dot_dimension_numbers<[1], [0], [0], [1], [0, 0, 1, 1], [], []>} : vector<4x8xf32>, vector<8x256xf32>, vector<4x256xf32> -> vector<4x256xf32>
    %cst_75 = arith.constant dense<0.000000e+00> : vector<4xf32>
    %118 = vector.multi_reduction <add>, %117, %cst_75 [1] : vector<4x256xf32> to vector<4xf32>
    %119 = vector.shape_cast %118 : vector<4xf32> to vector<4x1xf32>
    %cst_76 = arith.constant 2.560000e+02 : f32
    %120 = vector.broadcast %cst_76 : f32 to vector<4x1xf32>
    %121 = arith.divf %119, %120 : vector<4x1xf32>
    %c0_77 = arith.constant 0 : index
    %c0_78 = arith.constant 0 : index
    %122 = vector.load %arg6[%c0_77, %c0_78] : memref<4x1xf32, #tpu.memory_space<vmem>>, vector<4x1xf32>
    %123 = arith.addf %121, %122 : vector<4x1xf32>
    %124 = arith.negf %123 : vector<4x1xf32>
    %125 = math.exp %124 : vector<4x1xf32>
    %cst_79 = arith.constant 1.000000e+00 : f32
    %126 = vector.broadcast %cst_79 : f32 to vector<4x1xf32>
    %127 = arith.addf %126, %125 : vector<4x1xf32>
    %128 = arith.divf %126, %127 : vector<4x1xf32>
    %129 = vector.shape_cast %128 : vector<4x1xf32> to vector<4x1xf32>
    %130 = vector.broadcast %129 : vector<4x1xf32> to vector<4x72xf32>
    %131 = vector.extract_strided_slice %130 {offsets = [0, 0], sizes = [1, 72], strides = [1, 1]} : vector<4x72xf32> to vector<1x72xf32>
    %c0_80 = arith.constant 0 : index
    %c0_81 = arith.constant 0 : index
    %c0_82 = arith.constant 0 : index
    %132 = vector.load %arg7[%c0_80, %c0_81, %c0_82] : memref<4x8x72xf32, #tpu.memory_space<vmem>>, vector<1x8x72xf32>
    %133 = vector.shape_cast %132 : vector<1x8x72xf32> to vector<8x72xf32>
    %134 = vector.broadcast %131 : vector<1x72xf32> to vector<8x72xf32>
    %135 = arith.mulf %134, %133 : vector<8x72xf32>
    %136 = vector.extract_strided_slice %130 {offsets = [1, 0], sizes = [1, 72], strides = [1, 1]} : vector<4x72xf32> to vector<1x72xf32>
    %c1_83 = arith.constant 1 : index
    %c0_84 = arith.constant 0 : index
    %c0_85 = arith.constant 0 : index
    %137 = vector.load %arg7[%c1_83, %c0_84, %c0_85] : memref<4x8x72xf32, #tpu.memory_space<vmem>>, vector<1x8x72xf32>
    %138 = vector.shape_cast %137 : vector<1x8x72xf32> to vector<8x72xf32>
    %139 = vector.broadcast %136 : vector<1x72xf32> to vector<8x72xf32>
    %140 = arith.mulf %139, %138 : vector<8x72xf32>
    %141 = arith.addf %135, %140 : vector<8x72xf32>
    %142 = vector.extract_strided_slice %130 {offsets = [2, 0], sizes = [1, 72], strides = [1, 1]} : vector<4x72xf32> to vector<1x72xf32>
    %c2_86 = arith.constant 2 : index
    %c0_87 = arith.constant 0 : index
    %c0_88 = arith.constant 0 : index
    %143 = vector.load %arg7[%c2_86, %c0_87, %c0_88] : memref<4x8x72xf32, #tpu.memory_space<vmem>>, vector<1x8x72xf32>
    %144 = vector.shape_cast %143 : vector<1x8x72xf32> to vector<8x72xf32>
    %145 = vector.broadcast %142 : vector<1x72xf32> to vector<8x72xf32>
    %146 = arith.mulf %145, %144 : vector<8x72xf32>
    %147 = arith.addf %141, %146 : vector<8x72xf32>
    %148 = vector.extract_strided_slice %130 {offsets = [3, 0], sizes = [1, 72], strides = [1, 1]} : vector<4x72xf32> to vector<1x72xf32>
    %c3_89 = arith.constant 3 : index
    %c0_90 = arith.constant 0 : index
    %c0_91 = arith.constant 0 : index
    %149 = vector.load %arg7[%c3_89, %c0_90, %c0_91] : memref<4x8x72xf32, #tpu.memory_space<vmem>>, vector<1x8x72xf32>
    %150 = vector.shape_cast %149 : vector<1x8x72xf32> to vector<8x72xf32>
    %151 = vector.broadcast %148 : vector<1x72xf32> to vector<8x72xf32>
    %152 = arith.mulf %151, %150 : vector<8x72xf32>
    %153 = arith.addf %147, %152 : vector<8x72xf32>
    %c0_92 = arith.constant 0 : index
    %c128_93 = arith.constant 128 : index
    %154 = vector.load %arg11[%c0_92, %c128_93] : memref<8x512xf32, #tpu.memory_space<vmem>>, vector<8x256xf32>
    tpu.vector_store %arg11[%c0_92, %c128_93], %115 {strides = array<i32>} : memref<8x512xf32, #tpu.memory_space<vmem>>, vector<8x256xf32>,
    %c0_94 = arith.constant 0 : index
    %c111_95 = arith.constant 111 : index
    %155 = vector.load %arg11[%c0_94, %c111_95] : memref<8x512xf32, #tpu.memory_space<vmem>>, vector<8x256xf32>
    %156 = vector.broadcast %27 : vector<1x256xf32> to vector<8x256xf32>
    %157 = arith.mulf %155, %156 : vector<8x256xf32>
    %c0_96 = arith.constant 0 : index
    %c0_97 = arith.constant 0 : index
    %158 = vector.load %arg12[%c0_96, %c0_97] : memref<72x256xf32, #tpu.memory_space<vmem>>, vector<8x256xf32>
    tpu.vector_store %arg12[%c0_96, %c0_97], %157 {strides = array<i32>} : memref<72x256xf32, #tpu.memory_space<vmem>>, vector<8x256xf32>,
    %c0_98 = arith.constant 0 : index
    %c112_99 = arith.constant 112 : index
    %159 = vector.load %arg11[%c0_98, %c112_99] : memref<8x512xf32, #tpu.memory_space<vmem>>, vector<8x256xf32>
    %c8_100 = arith.constant 8 : index
    %c0_101 = arith.constant 0 : index
    %160 = vector.load %arg12[%c8_100, %c0_101] : memref<72x256xf32, #tpu.memory_space<vmem>>, vector<8x256xf32>
    tpu.vector_store %arg12[%c8_100, %c0_101], %159 {strides = array<i32>} : memref<72x256xf32, #tpu.memory_space<vmem>>, vector<8x256xf32>,
    %c0_102 = arith.constant 0 : index
    %c113_103 = arith.constant 113 : index
    %161 = vector.load %arg11[%c0_102, %c113_103] : memref<8x512xf32, #tpu.memory_space<vmem>>, vector<8x256xf32>
    %162 = vector.broadcast %38 : vector<1x256xf32> to vector<8x256xf32>
    %163 = arith.mulf %161, %162 : vector<8x256xf32>
    %c16 = arith.constant 16 : index
    %c0_104 = arith.constant 0 : index
    %164 = vector.load %arg12[%c16, %c0_104] : memref<72x256xf32, #tpu.memory_space<vmem>>, vector<8x256xf32>
    tpu.vector_store %arg12[%c16, %c0_104], %163 {strides = array<i32>} : memref<72x256xf32, #tpu.memory_space<vmem>>, vector<8x256xf32>,
    %c0_105 = arith.constant 0 : index
    %c127_106 = arith.constant 127 : index
    %165 = vector.load %arg11[%c0_105, %c127_106] : memref<8x512xf32, #tpu.memory_space<vmem>>, vector<8x256xf32>
    %166 = vector.broadcast %27 : vector<1x256xf32> to vector<8x256xf32>
    %167 = arith.mulf %165, %166 : vector<8x256xf32>
    %c24 = arith.constant 24 : index
    %c0_107 = arith.constant 0 : index
    %168 = vector.load %arg12[%c24, %c0_107] : memref<72x256xf32, #tpu.memory_space<vmem>>, vector<8x256xf32>
    tpu.vector_store %arg12[%c24, %c0_107], %167 {strides = array<i32>} : memref<72x256xf32, #tpu.memory_space<vmem>>, vector<8x256xf32>,
    %c0_108 = arith.constant 0 : index
    %c128_109 = arith.constant 128 : index
    %169 = vector.load %arg11[%c0_108, %c128_109] : memref<8x512xf32, #tpu.memory_space<vmem>>, vector<8x256xf32>
    %c32 = arith.constant 32 : index
    %c0_110 = arith.constant 0 : index
    %170 = vector.load %arg12[%c32, %c0_110] : memref<72x256xf32, #tpu.memory_space<vmem>>, vector<8x256xf32>
    tpu.vector_store %arg12[%c32, %c0_110], %169 {strides = array<i32>} : memref<72x256xf32, #tpu.memory_space<vmem>>, vector<8x256xf32>,
    %c0_111 = arith.constant 0 : index
    %c129_112 = arith.constant 129 : index
    %171 = vector.load %arg11[%c0_111, %c129_112] : memref<8x512xf32, #tpu.memory_space<vmem>>, vector<8x256xf32>
    %172 = vector.broadcast %38 : vector<1x256xf32> to vector<8x256xf32>
    %173 = arith.mulf %171, %172 : vector<8x256xf32>
    %c40 = arith.constant 40 : index
    %c0_113 = arith.constant 0 : index
    %174 = vector.load %arg12[%c40, %c0_113] : memref<72x256xf32, #tpu.memory_space<vmem>>, vector<8x256xf32>
    tpu.vector_store %arg12[%c40, %c0_113], %173 {strides = array<i32>} : memref<72x256xf32, #tpu.memory_space<vmem>>, vector<8x256xf32>,
    %c0_114 = arith.constant 0 : index
    %c143_115 = arith.constant 143 : index
    %175 = vector.load %arg11[%c0_114, %c143_115] : memref<8x512xf32, #tpu.memory_space<vmem>>, vector<8x256xf32>
    %176 = vector.broadcast %27 : vector<1x256xf32> to vector<8x256xf32>
    %177 = arith.mulf %175, %176 : vector<8x256xf32>
    %c48 = arith.constant 48 : index
    %c0_116 = arith.constant 0 : index
    %178 = vector.load %arg12[%c48, %c0_116] : memref<72x256xf32, #tpu.memory_space<vmem>>, vector<8x256xf32>
    tpu.vector_store %arg12[%c48, %c0_116], %177 {strides = array<i32>} : memref<72x256xf32, #tpu.memory_space<vmem>>, vector<8x256xf32>,
    %c0_117 = arith.constant 0 : index
    %c144_118 = arith.constant 144 : index
    %179 = vector.load %arg11[%c0_117, %c144_118] : memref<8x512xf32, #tpu.memory_space<vmem>>, vector<8x256xf32>
    %c56 = arith.constant 56 : index
    %c0_119 = arith.constant 0 : index
    %180 = vector.load %arg12[%c56, %c0_119] : memref<72x256xf32, #tpu.memory_space<vmem>>, vector<8x256xf32>
    tpu.vector_store %arg12[%c56, %c0_119], %179 {strides = array<i32>} : memref<72x256xf32, #tpu.memory_space<vmem>>, vector<8x256xf32>,
    %c0_120 = arith.constant 0 : index
    %c145_121 = arith.constant 145 : index
    %181 = vector.load %arg11[%c0_120, %c145_121] : memref<8x512xf32, #tpu.memory_space<vmem>>, vector<8x256xf32>
    %182 = vector.broadcast %38 : vector<1x256xf32> to vector<8x256xf32>
    %183 = arith.mulf %181, %182 : vector<8x256xf32>
    %c64 = arith.constant 64 : index
    %c0_122 = arith.constant 0 : index
    %184 = vector.load %arg12[%c64, %c0_122] : memref<72x256xf32, #tpu.memory_space<vmem>>, vector<8x256xf32>
    tpu.vector_store %arg12[%c64, %c0_122], %183 {strides = array<i32>} : memref<72x256xf32, #tpu.memory_space<vmem>>, vector<8x256xf32>,
    %c0_123 = arith.constant 0 : index
    %c0_124 = arith.constant 0 : index
    %185 = vector.load %arg12[%c0_123, %c0_124] : memref<72x256xf32, #tpu.memory_space<vmem>>, vector<72x256xf32>
    %cst_125 = arith.constant dense<0.000000e+00> : vector<8x256xf32>
    %186 = tpu.matmul %153, %185, %cst_125 {dimension_numbers = #tpu.dot_dimension_numbers<[1], [0], [0], [1], [0, 0, 1, 1], [], []>} : vector<8x72xf32>, vector<72x256xf32>, vector<8x256xf32> -> vector<8x256xf32>
    %187 = vector.extract_strided_slice %186 {offsets = [0, 0], sizes = [4, 256], strides = [1, 1]} : vector<8x256xf32> to vector<4x256xf32>
    %188 = vector.extract_strided_slice %186 {offsets = [4, 0], sizes = [4, 256], strides = [1, 1]} : vector<8x256xf32> to vector<4x256xf32>
    %189 = arith.negf %188 : vector<4x256xf32>
    %190 = math.exp %189 : vector<4x256xf32>
    %cst_126 = arith.constant 1.000000e+00 : f32
    %191 = vector.broadcast %cst_126 : f32 to vector<4x256xf32>
    %192 = arith.addf %191, %190 : vector<4x256xf32>
    %193 = arith.divf %191, %192 : vector<4x256xf32>
    %194 = arith.mulf %187, %193 : vector<4x256xf32>
    %195 = arith.addf %73, %194 : vector<4x256xf32>
    %c0_127 = arith.constant 0 : index
    %c0_128 = arith.constant 0 : index
    %196 = vector.load %arg8[%c0_127, %c0_128] : memref<4x1xf32, #tpu.memory_space<vmem>>, vector<4x1xf32>
    %197 = vector.broadcast %196 : vector<4x1xf32> to vector<4x256xf32>
    %198 = arith.mulf %195, %197 : vector<4x256xf32>
    %c0_129 = arith.constant 0 : index
    %c0_130 = arith.constant 0 : index
    %199 = vector.load %arg9[%c0_129, %c0_130] : memref<4x1xf32, #tpu.memory_space<vmem>>, vector<4x1xf32>
    %200 = vector.broadcast %199 : vector<4x1xf32> to vector<4x256xf32>
    %201 = arith.addf %198, %200 : vector<4x256xf32>
    %c0_131 = arith.constant 0 : index
    %c0_132 = arith.constant 0 : index
    %c0_133 = arith.constant 0 : index
    %202 = vector.load %arg10[%c0_131, %c0_132, %c0_133] : memref<1x4x256xf32, #tpu.memory_space<vmem>>, vector<1x4x256xf32>
    %203 = vector.shape_cast %202 : vector<1x4x256xf32> to vector<4x256xf32>
    %204 = vector.shape_cast %201 : vector<4x256xf32> to vector<1x4x256xf32>
    tpu.vector_store %arg10[%c0_131, %c0_132, %c0_133], %204 {strides = array<i32>} : memref<1x4x256xf32, #tpu.memory_space<vmem>>, vector<1x4x256xf32>,
    return
  }
  func.func @transform_0(%arg0: i32) -> (i32, i32, i32) {
    %c0_i32 = arith.constant 0 : i32
    %c0_i32_0 = arith.constant 0 : i32
    %c0_i32_1 = arith.constant 0 : i32
    return %arg0, %c0_i32, %c0_i32_0 : i32, i32, i32
  }
  func.func @transform_1(%arg0: i32) -> (i32, i32, i32, i32) {
    %c0_i32 = arith.constant 0 : i32
    %c0_i32_0 = arith.constant 0 : i32
    %c0_i32_1 = arith.constant 0 : i32
    %c0_i32_2 = arith.constant 0 : i32
    return %arg0, %c0_i32, %c0_i32_0, %c0_i32_1 : i32, i32, i32, i32
  }
  func.func @transform_2(%arg0: i32) -> (i32, i32) {
    %c0_i32 = arith.constant 0 : i32
    %c0_i32_0 = arith.constant 0 : i32
    %c0_i32_1 = arith.constant 0 : i32
    return %c0_i32, %c0_i32_0 : i32, i32
  }
  func.func @transform_3(%arg0: i32) -> (i32, i32) {
    %c0_i32 = arith.constant 0 : i32
    %c0_i32_0 = arith.constant 0 : i32
    %c0_i32_1 = arith.constant 0 : i32
    return %c0_i32, %c0_i32_0 : i32, i32
  }
  func.func @transform_4(%arg0: i32) -> (i32, i32) {
    %c0_i32 = arith.constant 0 : i32
    %c0_i32_0 = arith.constant 0 : i32
    %c0_i32_1 = arith.constant 0 : i32
    return %c0_i32, %c0_i32_0 : i32, i32
  }
  func.func @transform_5(%arg0: i32) -> (i32, i32) {
    %c0_i32 = arith.constant 0 : i32
    %c0_i32_0 = arith.constant 0 : i32
    %c0_i32_1 = arith.constant 0 : i32
    return %c0_i32, %c0_i32_0 : i32, i32
  }
  func.func @transform_6(%arg0: i32) -> (i32, i32, i32) {
    %c0_i32 = arith.constant 0 : i32
    %c0_i32_0 = arith.constant 0 : i32
    %c0_i32_1 = arith.constant 0 : i32
    %c0_i32_2 = arith.constant 0 : i32
    return %c0_i32, %c0_i32_0, %c0_i32_1 : i32, i32, i32
  }
  func.func @transform_7(%arg0: i32) -> (i32, i32) {
    %c0_i32 = arith.constant 0 : i32
    %c0_i32_0 = arith.constant 0 : i32
    %c0_i32_1 = arith.constant 0 : i32
    return %c0_i32, %c0_i32_0 : i32, i32
  }
  func.func @transform_8(%arg0: i32) -> (i32, i32) {
    %c0_i32 = arith.constant 0 : i32
    %c0_i32_0 = arith.constant 0 : i32
    %c0_i32_1 = arith.constant 0 : i32
    return %c0_i32, %c0_i32_0 : i32, i32
  }
  func.func @transform_9(%arg0: i32) -> (i32, i32, i32) {
    %c0_i32 = arith.constant 0 : i32
    %c0_i32_0 = arith.constant 0 : i32
    %c0_i32_1 = arith.constant 0 : i32
    return %arg0, %c0_i32, %c0_i32_0 : i32, i32, i32
  }
}

</mosaic_0001>

<bundles_post_ra>
// kernel: gated_resnet_forward.1
= control target key start
LH: loop header
LB: loop body
LE: loop exit
PB: predicated region body
PF: predicated region fallthrough
CT: control target
= control target key end

     0   :  { %s2150_s30 = smov 0   ;;  %s2438_s0 = inlined_call_operand.vmem [shape: f32[2,4,512], index: 0, kind: input, shape index: {}]   ;;  %s2439_s1 = inlined_call_operand.vmem [shape: f32[2,9,8,4], index: 1, kind: input, shape index: {}]   ;;  %s2440_s2 = inlined_call_operand.vmem [shape: f32[8,1], index: 2, kind: input, shape index: {}]   ;;  %s2441_s3 = inlined_call_operand.vmem [shape: f32[8,1], index: 3, kind: input, shape index: {}]   ;;  %s2442_s4 = inlined_call_operand.vmem [shape: f32[4,8], index: 4, kind: input, shape index: {}]   ;;  %s2443_s5 = inlined_call_operand.vmem [shape: f32[4,1], index: 5, kind: input, shape index: {}]   ;;  %s2444_s6 = inlined_call_operand.vmem [shape: f32[4,8,72], index: 6, kind: input, shape index: {}]   ;;  %s2445_s7 = inlined_call_operand.vmem [shape: f32[4,1], index: 7, kind: input, shape index: {}]   ;;  %s2446_s8 = inlined_call_operand.vmem [shape: f32[4,1], index: 8, kind: input, shape index: {}]   ;;  %s2447_s9 = inlined_call_operand.vmem [shape: f32[2,4,256], index: 9, kind: output, shape index: {}]  }
   0x1 LB: > { %s1879_s10 = sadd.s32 4294967295, %s2087_s30   ;;  %p1883_p0 = scmp.ge.s32.totalorder %s2087_s30, 1  ;;  %s2087_s30 = sphi %s2150_s30, %s19_s30  }
   0x2   : > { %p297_p1 = scmp.lt.s32.totalorder %s2087_s30, 3 }
   0x4   : > { %p298_p2 = pnand %p1883_p0, %p297_p1 }
   0x5   : > { %v353_v0 = vlaneseq (!%p298_p2)  ;;  %v2089_v1 = vmov (!%p298_p2), 0.0   ;;  %s2090_s11 = smov (!%p298_p2), 113   ;;  %s2091_s12 = smov (!%p298_p2), 1   ;;  %vm615_vm4 = vcmask (!%p298_p2), 924672   ;;  %vm720_vm5 = vcmask (!%p298_p2), 1039360  }
   0x6   : > { %301 = sbr.rel (%p298_p2) target bundleno = 1234 (0x4d2), region = 56  ;;  %706 = vmatprep.mubr.f32.mxu0 (!%p298_p2), %v2089_v1  ;;  %510 = vmatprep.mubr.f32.mxu1 (!%p298_p2), %v2089_v1  ;;  %s2092_s13 = smov (!%p298_p2), 127   ;;  %vm737_vm6 = vcmask (!%p298_p2), 7168   ;;  %vm632_vm7 = vcmask (!%p298_p2), 121856   ;;  %vm416_vm8 = vcmask (!%p298_p2), 908288   ;;  %vm526_vm9 = vcmask (!%p298_p2), 138240  }
   0x7   : > { %v354_v2 = vand.u32 (!%p298_p2), 127, %v353_v0  ;;  %s2093_s14 = smov (!%p298_p2), 15   ;;  %s2094_s15 = smov (!%p298_p2), 111   ;;  %v2098_v63 = vmov (!%p298_p2), 0   ;;  %vm441_vm10 = vcmask (!%p298_p2), 1043456   ;;  %vm437_vm11 = vcmask (!%p298_p2), 31744  }
   0x8   : > { %s2095_s16 = smov (!%p298_p2), 17   ;;  %p338_p3 = scmp.lt.s32.totalorder (!%p298_p2), %s1879_s10, 1  ;;  %2000 = vset.pattern.permute.xlu0 (!%p298_p2), %v2098_v63  ;;  %2001 = vset.pattern.permute.xlu1 (!%p298_p2), %v2098_v63  ;;  %vm434_vm12 = vcmask (!%p298_p2), 130048   ;;  %vm1124_vm13 = vcmask (!%p298_p2), 916480   ;;  %vm1329_vm14 = vcmask (!%p298_p2), 64512   ;;  %vm1683_vm15 = vcmask (!%p298_p2), 588800  }
   0x9   : > { %v355_v3 = vadd.s32 (!%p298_p2), 128, %v354_v2  ;;  %v360_v4 = vand.u32 (!%p298_p2), 15, %v354_v2  ;;  %s2096_s21 = smov (!%p298_p2), 16   ;;  %s2097_s22 = smov (!%p298_p2), 112   ;;  %v1310_v2 = vld [vmem:[%s2440_s2] sm:$0xff] (!%p298_p2) }
   0xb   : > { %v367_v5 = vand.u32 (!%p298_p2), 15, %v355_v3  ;;  %v392_v6 = vadd.s32 (!%p298_p2), 1, %v360_v4  ;;  %v380_v7 = vadd.s32 (!%p298_p2), 4294967295, %v360_v4  ;;  %v1318_v3 = vld [vmem:[%s2441_s3] sm:$0xff] (!%p298_p2) }
   0xd   : > { %v393_v8 = vadd.s32 1, %v367_v5  ;;  %vm396_vm0 = vcmp.lt.s32.totalorder %v392_v6, 16  ;;  %v381_v9 = vadd.s32 4294967295, %v367_v5  ;;  %vm382_vm1 = vcmp.ge.s32.totalorder %v380_v7, 0  ;;  %s2449_s10 = smov (!%p338_p3, %s1879_s10), 1 }
   0xe   : > { %v2162_v10 = vsel %vm396_vm0, 1.0, %v2089_v1  ;;  %v2168_v12 = vsel %vm382_vm1, 1.0, %v2089_v1  ;;  %s1938_s17 = sshll.u32 %s2449_s10, 4  ;;  %s1972_s27 = smul.u32 72, %s2449_s10 }
   0xf   : > { %vm397_vm2 = vcmp.lt.s32.totalorder %v393_v8, 16  ;;  %vm383_vm3 = vcmp.ge.s32.totalorder %v381_v9, 0  ;;  %s2193_s20 = scalar_lea.vmem %s2438_s0, %s1938_s17  ;;  %s1939_s19 = sshll.u32 %s2449_s10, 3 }
  0x10   : > { %v2165_v11 = vsel %vm397_vm2, 1.0, %v2089_v1  ;;  %v2171_v13 = vsel %vm383_vm3, 1.0, %v2089_v1  ;;  %v608_v17 = vld [vmem:[%s2193_s20 + $0x8] sm:$0xf]  ;;  %v2197_v18 = vld [vmem:[%s2193_s20] sm:$0xff]  ;;  %s2274_s17 = scalar_lea.vmem %s2439_s1, %s1972_s27 }
  0x11   : > { %v611_v14 = vcombine.low %v2162_v10, %v2165_v11  ;;  %v412_v15 = vcombine.low %v2168_v12, %v2171_v13  ;;  %v716_v32 = vld [vmem:[%s2193_s20 + $0x8] sm:$0xf]  ;;  %v906_v34 = vld [vmem:[%s2193_s20 + $0xc] sm:$0xf]  ;;  %v427_v48 = vcombine.high %v2197_v18, %v2197_v18  ;;  %v2002_v4 = vpack.i.bf16 %v2171_v13, %v2168_v12 }
  0x12   : > { %v2209_v33 = vld [vmem:[%s2193_s20 + $0x4] sm:$0xff]  ;;  %v1009_v43 = vld [vmem:[%s2193_s20 + $0xc] sm:$0xf]  ;;  %v2007_v5 = vpack.i.bf16 %v2165_v11, %v2162_v10  ;;  %v1900_v11 = vld [vmem:[%s2274_s17 + $0x10] sm:$0xff] }
  0x13   : > { %612 = vrot.lane.b32.xlu0 %v611_v14, %s2090_s11  ;;  %907 = vrot.lane.b32.xlu1 %v611_v14, %s2091_s12  ;;  %v409_v45 = vld [vmem:[%s2193_s20 + $0x8] sm:$0xf]  ;;  %v2232_v51 = vcombine.high %v2209_v33, %v2209_v33  ;;  %v1112_v53 = vld [vmem:[%s2193_s20 + $0xc] sm:$0xf] }
  0x14   : > { %v1208_v60 = vld [vmem:[%s2193_s20 + $0xc] sm:$0xf] }
  0x17   : > { %717 = vrot.lane.b32.xlu0 %v412_v15, %s2092_s13  ;;  %1010 = vrot.lane.b32.xlu1 %v412_v15, %s2093_s14 }
  0x1b   : > { %413 = vrot.lane.b32.xlu0 %v412_v15, %s2094_s15  ;;  %1209 = vrot.lane.b32.xlu1 %v611_v14, %s2095_s16 }
  0x85   : > { %v613_v16 = vpop.permute.xlu0 %612  ;;  %v908_v24 = vpop.permute.xlu1 %907 }
  0x86   : > { %v614_v19 = vrot.slane %v613_v16, 4  ;;  %v909_v29 = vrot.slane %v908_v24, 4 }
  0x88   : > { %v616_v20 = vsel %vm615_vm4, %v614_v19, %v613_v16  ;;  %v620_v21 = vmul.f32 %v614_v19, %v608_v17  ;;  %v910_v35 = vsel %vm737_vm6, %v909_v29, %v908_v24  ;;  %v914_v39 = vmul.f32 %v909_v29, %v906_v34  ;;  %v1904_v19 = vld [vmem:[%s2274_s17 + $0x18] sm:$0xff]  ;;  %v1912_v34 = vld [vmem:[%s2274_s17 + $0x28] sm:$0xff] }
  0x89   : > { %v619_v22 = vmul.f32 %v616_v20, %v2197_v18  ;;  %v718_v23 = vpop.permute.xlu0 %717  ;;  %v1011_v31 = vpop.permute.xlu1 %1010  ;;  %v913_v38 = vmul.f32 %v910_v35, %v2209_v33 }
  0x8a   : > { %v719_v25 = vrot.slane %v718_v23, 4  ;;  %630 = vrot.lane.b32.xlu1 %v620_v21, %s2093_s14  ;;  %v1012_v36 = vrot.slane %v1011_v31, 4 }
  0x8b   : > { %v625_v26 = vcombine.high %v619_v22, %v619_v22  ;;  %v919_v42 = vcombine.high %v913_v38, %v913_v38 }
  0x8c   : > { %v721_v27 = vsel %vm720_vm5, %v719_v25, %v718_v23  ;;  %v725_v37 = vmul.f32 %v719_v25, %v716_v32  ;;  %v1013_v40 = vsel %vm632_vm7, %v1012_v36, %v1011_v31  ;;  %v1017_v44 = vmul.f32 %v1012_v36, %v1009_v43  ;;  %v1908_v25 = vld [vmem:[%s2274_s17 + $0x20] sm:$0xff]  ;;  %v1916_v43 = vld [vmem:[%s2274_s17 + $0x30] sm:$0xff] }
  0x8d   : > { %v724_v28 = vmul.f32 %v721_v27, %v2197_v18  ;;  %628 = vrot.lane.b32.xlu0 %v625_v26, %s2093_s14  ;;  %v1016_v41 = vmul.f32 %v1013_v40, %v2209_v33  ;;  %v414_v46 = vpop.permute.xlu0 %413  ;;  %v1210_v50 = vpop.permute.xlu1 %1209 }
  0x8e   : > { %v415_v49 = vrot.slane %v414_v46, 4  ;;  %v1211_v54 = vrot.slane %v1210_v50, 4 }
  0x8f   : > { %v730_v30 = vcombine.high %v724_v28, %v724_v28  ;;  %v1022_v47 = vcombine.high %v1016_v41, %v1016_v41 }
  0x90   : > { %v417_v52 = vsel %vm416_vm8, %v415_v49, %v414_v46  ;;  %v1212_v56 = vsel %vm526_vm9, %v1211_v54, %v1210_v50  ;;  %v421_v57 = vmul.f32 %v415_v49, %v409_v45  ;;  %v1216_v61 = vmul.f32 %v1211_v54, %v1208_v60 }
  0x91   : > { %733 = vrot.lane.b32.xlu1 %v730_v30, %s2091_s12  ;;  %626 = vrot.lane.b32.xlu0 %v619_v22, %s2093_s14  ;;  %v420_v55 = vmul.f32 %v2197_v18, %v417_v52  ;;  %v1215_v58 = vmul.f32 %v1212_v56, %v2209_v33  ;;  %v1920_v52 = vld [vmem:[%s2274_s17 + $0x38] sm:$0xff] }
  0x93   : > { %v519_v59 = vcombine.high %v420_v55, %v420_v55  ;;  %v1221_v62 = vcombine.high %v1215_v58, %v1215_v58 }
  0x95   : > { %731 = vrot.lane.b32.xlu1 %v724_v28, %s2091_s12  ;;  %735 = vrot.lane.b32.xlu0 %v725_v37, %s2091_s12 }
  0x99   : > { %924 = vrot.lane.b32.xlu1 %v914_v39, %s2092_s13  ;;  %920 = vrot.lane.b32.xlu0 %v913_v38, %s2092_s13  ;;  %v1893_v39 = vld [vmem:[%s2274_s17 + $0x8] sm:$0xff] }
  0x9d   : > { %1023 = vrot.lane.b32.xlu1 %v1016_v41, %s2090_s11  ;;  %922 = vrot.lane.b32.xlu0 %v919_v42, %s2092_s13 }
  0xa1   : > { %1027 = vrot.lane.b32.xlu0 %v1017_v44, %s2090_s11  ;;  %432 = vrot.lane.b32.xlu1 %v409_v45, %s2096_s21 }
  0xa5   : > { %1025 = vrot.lane.b32.xlu1 %v1022_v47, %s2090_s11  ;;  %430 = vrot.lane.b32.xlu0 %v427_v48, %s2096_s21 }
  0xa9   : > { %1122 = vrot.lane.b32.xlu1 %v1112_v53, %s2097_s22  ;;  %1120 = vrot.lane.b32.xlu0 %v2232_v51, %s2097_s22 }
  0xad   : > { %1118 = vrot.lane.b32.xlu1 %v2209_v33, %s2097_s22  ;;  %428 = vrot.lane.b32.xlu0 %v2197_v18, %s2096_s21 }
  0xb1   : > { %524 = vrot.lane.b32.xlu1 %v421_v57, %s2095_s16  ;;  %522 = vrot.lane.b32.xlu0 %v519_v59, %s2095_s16 }
  0xb5   : > { %1226 = vrot.lane.b32.xlu1 %v1216_v61, %s2094_s15  ;;  %1224 = vrot.lane.b32.xlu0 %v1221_v62, %s2094_s15 }
  0xb9   : > { %1222 = vrot.lane.b32.xlu1 %v1215_v58, %s2094_s15  ;;  %520 = vrot.lane.b32.xlu0 %v420_v55, %s2095_s16  ;;  %v1924_v55 = vld [vmem:[%s2274_s17 + $0x40] sm:$0xff] }
  0xbd   : > { %1313 = vperm.xlu0 %2000, %v1310_v2   ;;  %1321 = vperm.xlu1 %2001, %v1318_v3  }
  0xc1   : > { %2003 = vrot.lane.b32.xlu0 %v2002_v4, %s2094_s15 }
  0xc5   : > { %2008 = vrot.lane.b32.xlu0 %v2007_v5, %s2090_s11 }
  0xc9   : > { %2013 = vrot.lane.b32.xlu0 %v2002_v4, %s2092_s13 }
  0xcd   : > { %2018 = vrot.lane.b32.xlu0 %v2007_v5, %s2091_s12 }
  0xd1   : > { %2023 = vrot.lane.b32.xlu0 %v2002_v4, %s2093_s14 }
  0xd5   : > { %2028 = vrot.lane.b32.xlu0 %v2007_v5, %s2095_s16 }
  0xfc   : > { %v631_v6 = vpop.permute.xlu1 %630 }
  0xff   : > { %v629_v7 = vpop.permute.xlu0 %628 }
 0x100   : > { %v634_v8 = vsel %vm632_vm7, %v629_v7, %v631_v6 }
 0x101   : > { %1901 = vmatprep.subr.msk.mxu0 %vm441_vm10, %v634_v8 }
 0x103   : > { %v734_v9 = vpop.permute.xlu1 %733  ;;  %v627_v10 = vpop.permute.xlu0 %626 }
 0x104   : > { %v633_v12 = vsel %vm632_vm7, %v627_v10, %v629_v7 }
 0x105   : > { %1902 = vmatpush1.msk.msra.mxu0 %vm441_vm10, %v633_v12  ;;  %v1328_v12 = vld [vmem:[%s2442_s4] sm:$0xf] }
 0x106   : > { %1903 = vmatmul.mubr.msk.f32.vlgmr.msra.gmra.mrb[0].mxu0 %vm437_vm11, %v1900_v11 }
 0x107   : > { %v732_v13 = vpop.permute.xlu1 %731  ;;  %v736_v14 = vpop.permute.xlu0 %735  ;;  %811 = vmatprep.mubr.f32.mxu0 %v2089_v1 }
 0x108   : > { %v738_v15 = vsel %vm737_vm6, %v732_v13, %v734_v9  ;;  %v739_v16 = vsel %vm737_vm6, %v734_v9, %v736_v14 }
 0x109   : > { %1905 = vmatprep.subr.msk.mxu0 %vm441_vm10, %v739_v16 }
 0x10a   : > { %1906 = vmatpush1.msk.msra.mxu0 %vm441_vm10, %v738_v15 }
 0x10b   : > { %v925_v17 = vpop.permute.xlu1 %924  ;;  %v921_v18 = vpop.permute.xlu0 %920  ;;  %1909 = vmatprep.subr.msk.mxu0 %vm441_vm10, %v2232_v51  ;;  %v422_v51 = vld [vmem:[%s2274_s17] sm:$0xff] }
 0x10e   : > { %1907 = vmatmul.mubr.msk.f32.vlgmr.msra.gmra.mrb[0].mxu0 %vm437_vm11, %v1904_v19 }
 0x10f   : > { %v1024_v20 = vpop.permute.xlu1 %1023  ;;  %v923_v21 = vpop.permute.xlu0 %922  ;;  %1910 = vmatpush1.msk.msra.mxu0 %vm441_vm10, %v2209_v33  ;;  %896 = vmatprep.mubr.f32.mxu0 %v2089_v1 }
 0x110   : > { %v927_v22 = vsel %vm720_vm5, %v923_v21, %v925_v17  ;;  %v926_v26 = vsel %vm720_vm5, %v921_v18, %v923_v21 }
 0x111   : > { %1913 = vmatprep.subr.msk.mxu0 %vm441_vm10, %v927_v22 }
 0x113   : > { %v1028_v23 = vpop.permute.xlu0 %1027  ;;  %v433_v24 = vpop.permute.xlu1 %432 }
 0x116   : > { %1911 = vmatmul.mubr.msk.f32.vlgmr.msra.gmra.mrb[0].mxu0 %vm437_vm11, %v1908_v25 }
 0x117   : > { %1914 = vmatpush1.msk.msra.mxu0 %vm441_vm10, %v926_v26  ;;  %v1026_v27 = vpop.permute.xlu1 %1025  ;;  %v431_v28 = vpop.permute.xlu0 %430  ;;  %999 = vmatprep.mubr.f32.mxu0 %v2089_v1 }
 0x118   : > { %v1030_v29 = vsel %vm615_vm4, %v1026_v27, %v1028_v23  ;;  %v436_v30 = vsel %vm434_vm12, %v431_v28, %v433_v24  ;;  %v1029_v36 = vsel %vm615_vm4, %v1024_v20, %v1026_v27 }
 0x119   : > { %1917 = vmatprep.subr.msk.mxu0 %vm441_vm10, %v1030_v29  ;;  %1894 = vmatprep.subr.msk.mxu1 %vm441_vm10, %v436_v30 }
 0x11b   : > { %v1123_v31 = vpop.permute.xlu1 %1122  ;;  %v1121_v32 = vpop.permute.xlu0 %1120 }
 0x11c   : > { %v1126_v35 = vsel %vm1124_vm13, %v1121_v32, %v1123_v31 }
 0x11e   : > { %1915 = vmatmul.mubr.msk.f32.vlgmr.msra.gmra.mrb[0].mxu0 %vm437_vm11, %v1912_v34 }
 0x11f   : > { %1918 = vmatpush1.msk.msra.mxu0 %vm441_vm10, %v1029_v36  ;;  %v1119_v37 = vpop.permute.xlu1 %1118  ;;  %v429_v38 = vpop.permute.xlu0 %428  ;;  %1102 = vmatprep.mubr.f32.mxu0 %v2089_v1 }
 0x120   : > { %v435_v40 = vsel %vm434_vm12, %v429_v38, %v431_v28  ;;  %1921 = vmatprep.subr.msk.mxu0 %vm441_vm10, %v1126_v35  ;;  %v1125_v44 = vsel %vm1124_vm13, %v1119_v37, %v1121_v32 }
 0x121   : > { %1895 = vmatpush1.msk.msra.mxu1 %vm441_vm10, %v435_v40 }
 0x122   : > { %1896 = vmatmul.mubr.msk.f32.vlgmr.msra.gmra.mrb[0].mxu1 %vm437_vm11, %v1893_v39 }
 0x123   : > { %v525_v41 = vpop.permute.xlu1 %524  ;;  %v523_v42 = vpop.permute.xlu0 %522  ;;  %600 = vmatprep.mubr.f32.mxu1 %v2089_v1 }
 0x124   : > { %v528_v45 = vsel %vm526_vm9, %v523_v42, %v525_v41 }
 0x125   : > { %1897 = vmatprep.subr.msk.mxu1 %vm441_vm10, %v528_v45 }
 0x126   : > { %1919 = vmatmul.mubr.msk.f32.vlgmr.msra.gmra.mrb[0].mxu0 %vm437_vm11, %v1916_v43  ;;  %v1783_v43 = vld [vmem:[%s2445_s7] sm:$0xf] }
 0x127   : > { %1922 = vmatpush1.msk.msra.mxu0 %vm441_vm10, %v1125_v44  ;;  %v1227_v46 = vpop.permute.xlu1 %1226  ;;  %v1225_v47 = vpop.permute.xlu0 %1224  ;;  %1198 = vmatprep.mubr.f32.mxu0 %v2089_v1 }
 0x128   : > { %v1229_v48 = vsel %vm416_vm8, %v1225_v47, %v1227_v46 }
 0x129   : > { %1925 = vmatprep.subr.msk.mxu0 %vm441_vm10, %v1229_v48 }
 0x12b   : > { %v1223_v49 = vpop.permute.xlu1 %1222  ;;  %v521_v50 = vpop.permute.xlu0 %520 }
 0x12c   : > { %v1228_v53 = vsel %vm416_vm8, %v1223_v49, %v1225_v47  ;;  %v527_v54 = vsel %vm526_vm9, %v521_v50, %v523_v42 }
 0x12d   : > { %1898 = vmatpush1.msk.msra.mxu1 %vm441_vm10, %v527_v54 }
 0x12e   : > { %1899 = vmatmul.mubr.msk.f32.vlgmr.msra.gmra.mrb[0].mxu1 %vm437_vm11, %v422_v51  ;;  %1923 = vmatmul.mubr.msk.f32.vlgmr.msra.gmra.mrb[0].mxu0 %vm437_vm11, %v1920_v52 }
 0x12f   : > { %1926 = vmatpush1.msk.msra.mxu0 %vm441_vm10, %v1228_v53  ;;  %1301 = vmatprep.mubr.f32.mxu0 %v2089_v1 }
 0x130   : > { %1397 = vmatprep.mubr.f32.mxu1 %v2089_v1 }
 0x136   : > { %1927 = vmatmul.mubr.msk.f32.vlgmr.msra.gmra.mrb[0].mxu0 %vm437_vm11, %v1924_v55 }
 0x13c   : > { %v1314_v58 = vpop.permute.xlu0 %1313  ;;  %v1322_v4 = vpop.permute.xlu1 %1321 }
 0x140   : > { %v2004_v60 = vpop.permute.xlu0 %2003 }
 0x141   : > { %v2006_v63 = vunpack.i.h.bf16 %v2004_v60  ;;  %v2005_v2 = vunpack.i.l.bf16 %v2004_v60 }
 0x143   : > { %v1458_v8 = vsel %vm416_vm8, %v2005_v2, %v2006_v63  ;;  %v1462_v24 = vmul.f32 0.0, %v2005_v2 }
 0x144   : > { %v2009_v14 = vpop.permute.xlu0 %2008 }
 0x145   : > { %v2011_v17 = vunpack.i.h.bf16 %v2009_v14  ;;  %v2010_v18 = vunpack.i.l.bf16 %v2009_v14 }
 0x147   : > { %v1505_v21 = vsel %vm615_vm4, %v2010_v18, %v2011_v17  ;;  %v1509_v32 = vmul.f32 0.0, %v2010_v18 }
 0x148   : > { %v2014_v19 = vpop.permute.xlu0 %2013 }
 0x149   : > { %v2016_v22 = vunpack.i.h.bf16 %v2014_v19  ;;  %v2015_v23 = vunpack.i.l.bf16 %v2014_v19 }
 0x14b   : > { %v1534_v27 = vsel %vm720_vm5, %v2015_v23, %v2016_v22  ;;  %v1538_v35 = vmul.f32 0.0, %v2015_v23 }
 0x14c   : > { %v2019_v34 = vpop.permute.xlu0 %2018 }
 0x14d   : > { %v2020_v36 = vunpack.i.l.bf16 %v2019_v34 }
 0x150   : > { %v2024_v37 = vpop.permute.xlu0 %2023 }
 0x151   : > { %v2026_v60 = vunpack.i.h.bf16 %v2024_v37 }
 0x154   : > { %v2029_v40 = vpop.permute.xlu0 %2028 }
 0x155   : > { %v2031_v41 = vunpack.i.h.bf16 %v2029_v40 }
 0x157   : > { %v1649_v42 = vmul.f32 0.0, %v2031_v41 }
 0x201   : > { %v602_v56 = vpop.f32.mrb[0].mxu1 }
 0x202   : > { %v604_v57 = vpop.f32.mrb[1].mxu1 }
 0x209   : > { %v1303_v59 = vpop.f32.mrb[0].mxu0 }
 0x20a   : > { %v1956_v61 = vadd.f32 %v1303_v59, %v602_v56  ;;  %v1305_v62 = vpop.f32.mrb[1].mxu0 }
 0x20b   : > { %v1957_v3 = vadd.f32 %v1305_v62, %v604_v57 }
 0x20c   : > { %v1316_v5 = vmul.f32 %v1956_v61, %v1314_v58  ;;  %v2025_v61 = vunpack.i.l.bf16 %v2024_v37 }
 0x20d   : > { %v1317_v6 = vmul.f32 %v1957_v3, %v1314_v58  ;;  %v2021_v58 = vunpack.i.h.bf16 %v2019_v34  ;;  %v1602_v3 = vmul.f32 0.0, %v2026_v60 }
 0x20e   : > { %v1324_v7 = vadd.f32 %v1322_v4, %v1316_v5  ;;  %v1596_v2 = vsel %vm632_vm7, %v2025_v61, %v2026_v60 }
 0x20f   : > { %v1325_v9 = vadd.f32 %v1322_v4, %v1317_v6  ;;  %v1567_v59 = vsel %vm737_vm6, %v2020_v36, %v2021_v58  ;;  %v1573_v62 = vmul.f32 0.0, %v2021_v58 }
 0x210   : > { %v2338_v10 = vmax.f32 %v1324_v7, 0.0  ;;  %v2030_v7 = vunpack.i.l.bf16 %v2029_v40 }
 0x211   : > { %v2340_v11 = vmax.f32 %v1325_v9, 0.0 }
 0x212   : > { %v1463_v13 = vmul.f32 %v1458_v8, %v2338_v10  ;;  %v1510_v25 = vmul.f32 %v1505_v21, %v2338_v10  ;;  %v1539_v29 = vmul.f32 %v1534_v27, %v2338_v10  ;;  %v1571_v38 = vmul.f32 %v2020_v36, %v2338_v10  ;;  %v1411_v21 = vld [vmem:[%s2443_s5] sm:$0xf] }
 0x213   : > { %1333 = vmatprep.subr.mxu1 %v2340_v11  ;;  %v1464_v15 = vmul.f32 %v2006_v63, %v2340_v11  ;;  %v2037_v20 = vpack.i.bf16 %v2340_v11, %v2338_v10  ;;  %v1511_v26 = vmul.f32 %v2011_v17, %v2340_v11  ;;  %v1540_v30 = vmul.f32 %v2016_v22, %v2340_v11 }
 0x214   : > { %1334 = vmatpush1.msra.mxu1 %v2338_v10  ;;  %v2062_v39 = vpack.i.bf16 %v2089_v1, %v2340_v11  ;;  %v1572_v63 = vmul.f32 %v1567_v59, %v2340_v11  ;;  %v1601_v5 = vmul.f32 %v1596_v2, %v2340_v11  ;;  %v1600_v8 = vmul.f32 %v2025_v61, %v2338_v10 }
 0x215   : > { %1928 = vmatmul.mubr.msk.f32.vlgmr.msra.gmra.mrb[2].mxu1 %vm1329_vm14, %v1328_v12  ;;  %v2032_v16 = vpack.i.bf16 %v1464_v15, %v1463_v13  ;;  %v2042_v28 = vpack.i.bf16 %v1511_v26, %v1510_v25  ;;  %v2047_v31 = vpack.i.bf16 %v1540_v30, %v1539_v29  ;;  %v1643_v9 = vsel %vm526_vm9, %v2030_v7, %v2031_v41  ;;  %v1797_v13 = vld [vmem:[%s2446_s8] sm:$0xf] }
 0x216   : > { %1751 = vmatprep.mubr.f32.mxu1 %v2089_v1  ;;  %v2052_v4 = vpack.i.bf16 %v1573_v62, %v1572_v63  ;;  %v2057_v6 = vpack.i.bf16 %v1602_v3, %v1601_v5  ;;  %v1648_v12 = vmul.f32 %v1643_v9, %v2340_v11 }
 0x217   : > { %2033 = vrot.lane.b32.xlu0 %v2032_v16, %s2095_s16 }
 0x21b   : > { %2038 = vrot.lane.b32.xlu0 %v2037_v20, %s2096_s21 }
 0x21f   : > { %1468 = vrot.lane.b32.xlu0 %v1462_v24, %s2095_s16  ;;  %s352_s16 = scalar_lea.vmem %s2447_s9, %s1939_s19 }
 0x223   : > { %2043 = vrot.lane.b32.xlu0 %v2042_v28, %s2093_s14 }
 0x227   : > { %2048 = vrot.lane.b32.xlu0 %v2047_v31, %s2091_s12 }
 0x22b   : > { %1515 = vrot.lane.b32.xlu0 %v1509_v32, %s2093_s14 }
 0x22f   : > { %1544 = vrot.lane.b32.xlu0 %v1538_v35, %s2091_s12 }
 0x233   : > { %1577 = vrot.lane.b32.xlu0 %v1571_v38, %s2092_s13 }
 0x237   : > { %2063 = vrot.lane.b32.xlu0 %v2062_v39, %s2097_s22 }
 0x23b   : > { %1624 = vrot.lane.b32.xlu0 %v2338_v10, %s2097_s22 }
 0x23f   : > { %1657 = vrot.lane.b32.xlu0 %v1649_v42, %s2094_s15 }
 0x243   : > { %1786 = vperm.xlu0 %2000, %v1783_v43  }
 0x289   : > { %v2034_v44 = vpop.permute.xlu0 %2033 }
 0x28a   : > { %v2036_v45 = vunpack.i.h.bf16 %v2034_v44  ;;  %v2035_v46 = vunpack.i.l.bf16 %v2034_v44 }
 0x28c   : > { %v1475_v50 = vsel %vm526_vm9, %v2035_v46, %v2036_v45 }
 0x28d   : > { %v2039_v47 = vpop.permute.xlu0 %2038 }
 0x28e   : > { %v2041_v48 = vunpack.i.h.bf16 %v2039_v47  ;;  %v2040_v49 = vunpack.i.l.bf16 %v2039_v47 }
 0x290   : > { %v1493_v51 = vsel %vm434_vm12, %v2040_v49, %v2041_v48 }
 0x291   : > { %v1940_v52 = vpack.c.bf16 %v1493_v51, %v1475_v50  ;;  %v1469_v14 = vpop.permute.xlu0 %1468 }
 0x292   : > { %v1474_v30 = vsel %vm526_vm9, %v1469_v14, %v2035_v46 }
 0x293   : > { %1941 = vmatprep.subr.bf16.mxu1 %v1940_v52 }
 0x295   : > { %v2044_v15 = vpop.permute.xlu0 %2043 }
 0x296   : > { %v2046_v24 = vunpack.i.h.bf16 %v2044_v15  ;;  %v2045_v25 = vunpack.i.l.bf16 %v2044_v15 }
 0x298   : > { %v1522_v35 = vsel %vm632_vm7, %v2045_v25, %v2046_v24 }
 0x299   : > { %v2049_v16 = vpop.permute.xlu0 %2048 }
 0x29a   : > { %v2051_v19 = vunpack.i.h.bf16 %v2049_v16  ;;  %v2050_v20 = vunpack.i.l.bf16 %v2049_v16 }
 0x29c   : > { %v1551_v29 = vsel %vm737_vm6, %v2050_v20, %v2051_v19 }
 0x29d   : > { %v1516_v17 = vpop.permute.xlu0 %1515  ;;  %v1944_v37 = vpack.c.bf16 %v1551_v29, %v1522_v35 }
 0x29e   : > { %v1521_v40 = vsel %vm632_vm7, %v1516_v17, %v2045_v25  ;;  %v1932_v17 = vld [vmem:[%s2444_s6 + $0x18] sm:$0xff] }
 0x2a1   : > { %v1545_v18 = vpop.permute.xlu0 %1544 }
 0x2a2   : > { %v1550_v36 = vsel %vm737_vm6, %v1545_v18, %v2050_v20 }
 0x2a3   : > { %v1946_v43 = vpack.c.bf16 %v1550_v36, %v1521_v40 }
 0x2a5   : > { %v1578_v26 = vpop.permute.xlu0 %1577 }
 0x2a9   : > { %v2064_v38 = vpop.permute.xlu0 %2063 }
 0x2aa   : > { %v2066_v44 = vunpack.i.h.bf16 %v2064_v38  ;;  %v2065_v45 = vunpack.i.l.bf16 %v2064_v38 }
 0x2ad   : > { %v1625_v52 = vpop.permute.xlu0 %1624 }
 0x2ae   : > { %v1630_v59 = vsel %vm1124_vm13, %v1625_v52, %v2065_v45 }
 0x2b1   : > { %v1658_v62 = vpop.permute.xlu0 %1657 }
 0x2e8   : > { %v1399_v53 = vpop.f32.mrb[2].mxu1 }
 0x2e9   : > { %v1404_v54 = vsel %vm441_vm10, %v1399_v53, 0.0  ;;  %v1401_v55 = vpop.f32.mrb[3].mxu1 }
 0x2ea   : > { %v1405_v56 = vsel %vm441_vm10, %v1401_v55, 0.0  ;;  %v1631_v55 = vsel %vm1124_vm13, %v2065_v45, %v2066_v44  ;;  %v1787_v44 = vpop.permute.xlu0 %1786 }
 0x2eb   : > { %v1406_v57 = vadd.f32 %v1405_v56, %v1404_v54 }
 0x2ed   : > { %1407 = vadd.xlane.f32.xlu1 %v1406_v57 }
 0x2fe   : > { %1486 = vrot.lane.b32.xlu1 %v2089_v1, %s2096_s21  ;;  %v1647_v1 = vmul.f32 %v2030_v7, %v2338_v10 }
 0x302   : > { %2053 = vrot.lane.b32.xlu1 %v2052_v4, %s2092_s13 }
 0x306   : > { %2058 = vrot.lane.b32.xlu1 %v2057_v6, %s2090_s11 }
 0x30a   : > { %1606 = vrot.lane.b32.xlu1 %v1600_v8, %s2090_s11  ;;  %v1419_v8 = vld [vmem:[%s2444_s6] sm:$0xff] }
 0x30e   : > { %1655 = vrot.lane.b32.xlu1 %v1648_v12, %s2094_s15  ;;  %v1930_v12 = vld [vmem:[%s2444_s6 + $0x8] sm:$0xff] }
 0x312   : > { %1653 = vrot.lane.b32.xlu1 %v1647_v1, %s2094_s15 }
 0x316   : > { %1800 = vperm.xlu1 %2001, %v1797_v13   ;;  %v1931_v13 = vld [vmem:[%s2444_s6 + $0x10] sm:$0xff] }
 0x37a   : > { %v1408_v22 = vpop.xlane.xlu1 %1407 }
 0x37b   : > { %v1410_v23 = vmul.f32 0.00390625, %v1408_v22 }
 0x37d   : > { %v1412_v27 = vadd.f32 %v1411_v21, %v1410_v23 }
 0x37e   : > { %v1487_v28 = vpop.permute.xlu1 %1486 }
 0x37f   : > { %v1929_v31 = vmul.f32 -1.442695, %v1412_v27  ;;  %v1492_v32 = vsel %vm434_vm12, %v1487_v28, %v2040_v49 }
 0x380   : > { %v1942_v34 = vpack.c.bf16 %v1492_v32, %v1474_v30  ;;  %v2099_v32 = vmov 839922192  }
 0x381   : > { %2069 = vpow2.f32 %v1929_v31 }
 0x382   : > { %v2054_v39 = vpop.permute.xlu1 %2053  ;;  %1943 = vmatpush1.bf16.msra.mxu1 %v1942_v34  ;;  %v1789_v34 = vunpack.c.l.s4 %v2099_v32 }
 0x383   : > { %v2056_v41 = vunpack.i.h.bf16 %v2054_v39  ;;  %v2055_v42 = vunpack.i.l.bf16 %v2054_v39  ;;  %1945 = vmatprep.subr.bf16.mxu1 %v1944_v37  ;;  %v1792_v37 = vshrl.u32 %v353_v0, 7 }
 0x384   : > { %v1790_v36 = vunpack.c.0.s8 %v1789_v34 }
 0x385   : > { %v1583_v46 = vsel %vm720_vm5, %v1578_v26, %v2055_v42  ;;  %v1584_v47 = vsel %vm720_vm5, %v2055_v42, %v2056_v41 }
 0x386   : > { %v2059_v48 = vpop.permute.xlu1 %2058  ;;  %1947 = vmatpush1.bf16.msra.mxu1 %v1946_v43  ;;  %v1948_v49 = vpack.c.bf16 %v1584_v47, %v2340_v11  ;;  %v1950_v53 = vpack.c.bf16 %v1583_v46, %v2338_v10  ;;  %v1793_v42 = vsub.s32 %v1790_v36, %v1792_v37 }
 0x387   : > { %v2061_v50 = vunpack.i.h.bf16 %v2059_v48  ;;  %v2060_v51 = vunpack.i.l.bf16 %v2059_v48 }
 0x388   : > { %1949 = vmatprep.subr.bf16.mxu1 %v1948_v49  ;;  %v1794_v47 = vrot.slane %v1787_v44, %v1793_v42 }
 0x389   : > { %v1613_v54 = vsel %vm615_vm4, %v2060_v51, %v2061_v50 }
 0x38a   : > { %v1607_v56 = vpop.permute.xlu1 %1606  ;;  %1951 = vmatpush1.bf16.msra.mxu1 %v1950_v53  ;;  %v1952_v57 = vpack.c.bf16 %v1631_v55, %v1613_v54 }
 0x38b   : > { %v2070_v58 = vpop.eup %2069  ;;  %v1612_v60 = vsel %vm615_vm4, %v1607_v56, %v2060_v51 }
 0x38c   : > { %v1416_v61 = vadd.f32 1.0, %v2070_v58  ;;  %v1954_v11 = vpack.c.bf16 %v1630_v59, %v1612_v60  ;;  %1953 = vmatprep.subr.bf16.mxu1 %v1952_v57 }
 0x38e   : > { %2071 = vrcp.f32 %v1416_v61  ;;  %v1656_v63 = vpop.permute.xlu1 %1655  ;;  %1955 = vmatpush1.bf16.msra.mxu1 %v1954_v11 }
 0x38f   : > { %v1660_v10 = vsel %vm416_vm8, %v1656_v63, %v1658_v62 }
 0x390   : > { %1703 = vmatprep.subr.mxu1 %v1660_v10 }
 0x392   : > { %v1654_v2 = vpop.permute.xlu1 %1653 }
 0x393   : > { %v1659_v3 = vsel %vm416_vm8, %v1654_v2, %v1656_v63 }
 0x394   : > { %1704 = vmatpush1.msra.mxu1 %v1659_v3 }
 0x396   : > { %v1801_v46 = vpop.permute.xlu1 %1800 }
 0x397   : > { %v1808_v49 = vrot.slane %v1801_v46, %v1793_v42 }
 0x398   : > { %v2072_v4 = vpop.eup %2071 }
 0x399   : > { %1973 = vpush %v2072_v4  ;;  %v1427_v5 = vrot.slane %v2072_v4, 1  ;;  %v1435_v6 = vrot.slane %v2072_v4, 2  ;;  %v1443_v7 = vrot.slane %v2072_v4, 3 }
 0x39b   : > { %1975 = vpush %v1427_v5 }
 0x39c   : > { %1977 = vpush %v1435_v6 }
 0x39d   : > { %1979 = vpush %v1443_v7 }
 0x3ca   : > { %s1974_s15 = spop %1973 }
 0x3cb   : > { %v1422_v9 = vstv %s1974_s15 }
 0x3cc   : > { %s1976_s25 = spop %1975  ;;  %v1424_v14 = vmul.f32 %v1422_v9, %v1419_v8 }
 0x3cd   : > { %v1429_v1 = vstv %s1976_s25  ;;  %s1978_s28 = spop %1977 }
 0x3ce   : > { %v1431_v15 = vmul.f32 %v1930_v12, %v1429_v1  ;;  %v1437_v16 = vstv %s1978_s28  ;;  %s1980_s29 = spop %1979 }
 0x3cf   : > { %v1445_v18 = vstv %s1980_s29  ;;  %v1439_v20 = vmul.f32 %v1931_v13, %v1437_v16 }
 0x3d0   : > { %v1432_v19 = vadd.f32 %v1431_v15, %v1424_v14  ;;  %v1447_v22 = vmul.f32 %v1932_v17, %v1445_v18 }
 0x3d2   : > { %v1440_v21 = vadd.f32 %v1439_v20, %v1432_v19 }
 0x3d4   : > { %v1448_v23 = vadd.f32 %v1447_v22, %v1440_v21 }
 0x3d6   : > { %1933 = vmatmul.mubr.msk.f32.vlgmr.msra.gmra.mrb[4].mxu1 %vm1683_vm15, %v1448_v23 }
 0x4a9   : > { %v1753_v24 = vpop.f32.mrb[4].mxu1 }
 0x4aa   : > { %v1934_v25 = vmul.f32 -1.442695, %v1753_v24  ;;  %v1755_v26 = vpop.f32.mrb[5].mxu1 }
 0x4ab   : > { %v1935_v27 = vmul.f32 -1.442695, %v1755_v26 }
 0x4ac   : > { %2073 = vpow2.f32 %v1934_v25 }
 0x4ad   : > { %2075 = vpow2.f32 %v1935_v27 }
 0x4b6   : > { %v2074_v28 = vpop.eup %2073 }
 0x4b7   : > { %v2076_v29 = vpop.eup %2075  ;;  %v1764_v30 = vadd.f32 1.0, %v2074_v28 }
 0x4b8   : > { %v1765_v31 = vadd.f32 1.0, %v2076_v29 }
 0x4b9   : > { %2077 = vrcp.f32 %v1764_v30 }
 0x4ba   : > { %2079 = vrcp.f32 %v1765_v31 }
 0x4c3   : > { %v2078_v35 = vpop.eup %2077 }
 0x4c4   : > { %v2080_v38 = vpop.eup %2079  ;;  %v1772_v39 = vrot.slane %v2078_v35, 4 }
 0x4c5   : > { %v1773_v40 = vrot.slane %v2080_v38, 4 }
 0x4c6   : > { %v1776_v41 = vmul.f32 %v1772_v39, %v1753_v24 }
 0x4c7   : > { %v1777_v43 = vmul.f32 %v1773_v40, %v1755_v26 }
 0x4c9   : > { %v1780_v45 = vcombine.low %v1776_v41, %v1777_v43 }
 0x4cb   : > { %v1782_v48 = vadd.f32 %v1780_v45, %v2209_v33 }
 0x4cd   : > { %v1796_v50 = vmul.f32 %v1794_v47, %v1782_v48 }
 0x4cf   : > { %v1810_v0 = vadd.f32 %v1808_v49, %v1796_v50 }
 0x4d1   : > { %1811 = vst [vmem:[%s352_s16] sm:$0xff] %v1810_v0 }
 0x4d2 PF: > { %s19_s30 = sadd.s32 1, %s2087_s30  }
 0x4d3   : > { %p16_p4 = scmp.ge.s32.totalorder %s19_s30, 4  }
 0x4d5   :  { %18 = sbr.rel (!%p16_p4) target bundleno = 1 (0x1), region = 100 }

</bundles_post_ra>
